<compile_context>
chip_gen: v7x
topology: tpu7x:2x2x1
jax: 0.10.0
libtpu: 0.0.40
codegen_flags: <defaults>
</compile_context>

<pallas_src>
import numpy as np
import jax
import jax.numpy as jnp
from jax.experimental import pallas as pl
from jax.experimental.pallas import tpu as pltpu


def _seq_mask_gather_kernel(idx_ref, nd_ref, x_ref, o_ref):
    """Build TQ destination rows of one sequence.

    idx_ref: (B*T,) int32 SMEM -- source row index for flat destination b*T + t
    nd_ref:  (B,)   int32 SMEM -- number of dropped rows in sequence b
    x_ref:   (1, T, D) VMEM    -- full source sequence of batch b (stays
                                  resident across the tq steps of this batch)
    o_ref:   (1, TQ, D) VMEM   -- destination tile (rows tq*TQ .. tq*TQ+TQ-1)
    """
    b = pl.program_id(0)
    tq = pl.program_id(1)
    T = x_ref.shape[1]
    TQ = o_ref.shape[1]
    nd = nd_ref[b]                      # scalar: #dropped rows in sequence b
    base = tq * TQ
    # Unrolled row loop: dynamic-sublane load from the VMEM slab, static store.
    for r in range(TQ):
        dest_t = base + r
        src = idx_ref[b * T + dest_t]   # SMEM scalar read
        keep = dest_t >= nd             # kept rows occupy the suffix
        row = x_ref[:, pl.ds(src, 1), :]                      # (1, 1, D)
        # Select (not multiply): dropped rows become exact zeros, no NaN/Inf
        # propagation from dropped source rows.
        o_ref[:, r:r + 1, :] = jnp.where(keep, row, jnp.zeros_like(row))


def _pick_tq(T, max_tq=256):
    """Largest multiple-of-8 divisor of T that is <= max_tq (else T itself)."""
    best = None
    for cand in range(8, min(T, max_tq) + 1, 8):
        if T % cand == 0:
            best = cand
    return best if best is not None else T


def _pallas_masked_gather(x, idx_flat, num_dropped, tq=None):
    """out[b, t] = x[b, idx_flat[b*T + t]] if t >= num_dropped[b] else 0."""
    B, T, D = x.shape
    TQ = _pick_tq(T) if tq is None else tq
    assert T % TQ == 0, "TQ must divide T"

    itemsize = jnp.dtype(x.dtype).itemsize
    # Double-buffered per-batch source slab + double-buffered output tile.
    vmem_need = 2 * (T * D + TQ * D) * itemsize
    vmem_limit = int(min(max(vmem_need * 5 // 4 + (1 << 20), 16 << 20), 64 << 20))
    # TODO(synk): for sequences whose (T, D) slab exceeds ~48 MiB, switch to a
    # manual double-buffered make_async_copy gather from a memory_space=pl.ANY
    # HBM ref (and skip the DMAs of dropped source rows entirely).

    grid_spec = pltpu.PrefetchScalarGridSpec(
        num_scalar_prefetch=2,
        grid=(B, T // TQ),
        in_specs=[
            # Whole sequence of batch b resident in VMEM across its tq steps
            # (same block index for every tq -> Pallas skips the re-DMA).
            pl.BlockSpec((1, T, D), lambda b, t, idx_r, nd_r: (b, 0, 0)),
        ],
        out_specs=pl.BlockSpec((1, TQ, D), lambda b, t, idx_r, nd_r: (b, t, 0)),
    )
    return pl.pallas_call(
        _seq_mask_gather_kernel,
        out_shape=jax.ShapeDtypeStruct((B, T, D), x.dtype),
        grid_spec=grid_spec,
        compiler_params=pltpu.CompilerParams(
            dimension_semantics=("parallel", "parallel"),
            vmem_limit_bytes=vmem_limit,
        ),
    )(idx_flat, num_dropped, x)


def seq_masking_apply(x, mask, tq=None):
    """Core SeqMasking transform.

    x:    (B, T, D)
    mask: (B, T) bool, True = keep the row.
    Kept rows of each sequence are compacted (original order) to the END of the
    sequence; the leading (T - num_kept) rows are zeros.
    """
    B, T, D = x.shape
    keep = mask.astype(jnp.int32)
    # Stable ascending argsort of the 0/1 keep flags: dropped rows first,
    # kept rows last, original order preserved inside each group -- exactly the
    # destination layout produced by the PyTorch module.
    idx = jnp.argsort(keep, axis=1, stable=True).astype(jnp.int32)
    num_dropped = (T - keep.sum(axis=1)).astype(jnp.int32)
    return _pallas_masked_gather(x, idx.reshape(B * T), num_dropped, tq=tq)


class SeqMasking:
    """JAX/Pallas port of the PyTorch SeqMasking module (forward semantics).

    key_padding_mask / seq_len are passed through unchanged, matching the
    reference module.  Note: under jax.jit pass rng_key explicitly -- the
    internal key split is a Python-level side effect and only happens at trace
    time.
    """

    def __init__(self, p, seed=0):
        self.p = p
        self.training = True
        self._key = jax.random.PRNGKey(seed)

    def __call__(self, x, key_padding_mask=None, seq_len=None, p=None, rng_key=None):
        if p is None:
            p = self.p
        if p == 0 or not self.training:
            return (x, key_padding_mask, seq_len)
        if rng_key is None:
            self._key, rng_key = jax.random.split(self._key)
        B, T, _ = x.shape
        # torch.rand(B, T) > p  ==> keep a row with probability (1 - p)
        mask = jax.random.uniform(rng_key, (B, T)) > p
        new_x = seq_masking_apply(x, mask)
        return (new_x, key_padding_mask, seq_len)


if __name__ == "__main__":
    def _ref(x_np, m_np):
        Bn, Tn, Dn = x_np.shape
        out = np.zeros_like(x_np)
        for b in range(Bn):
            kept = x_np[b][m_np[b]]
            l = kept.shape[0]
            if l > 0:
                out[b, Tn - l:] = kept
        return out

    key = jax.random.PRNGKey(0)
    k1, k2, k3 = jax.random.split(key, 3)

    # Test 1: D a multiple of 128 (lane-dense unmasked stores).
    B, T, D = 2, 8, 128
    x = jax.random.normal(k1, (B, T, D), dtype=jnp.float32)
    mask = jax.random.uniform(k2, (B, T)) > 0.5   # True = keep
    out = jax.block_until_ready(seq_masking_apply(x, mask))
    np.testing.assert_array_equal(np.asarray(out),
                                  _ref(np.asarray(x), np.asarray(mask)))
    assert out.dtype == x.dtype and out.shape == x.shape

    # Test 2: ragged feature dim (D % 128 != 0), no wrapper pad/slice, plus a
    # NaN-filled dropped row that must come out as exact zeros (select, not mul).
    B2, T2, D2 = 2, 8, 96
    x2 = jax.random.normal(k3, (B2, T2, D2), dtype=jnp.float32)
    x2 = x2.at[:, 0, :].set(jnp.nan)
    m2 = np.ones((B2, T2), dtype=bool)
    m2[:, 0] = False          # NaN row is always dropped
    m2[0, 3] = False
    out2 = jax.block_until_ready(seq_masking_apply(x2, jnp.asarray(m2)))
    np.testing.assert_array_equal(np.asarray(out2), _ref(np.asarray(x2), m2))
    assert not np.isnan(np.asarray(out2)).any()

    # Module path: active forward, and the p=0 early return.
    mod = SeqMasking(p=0.5, seed=0)
    new_x, kpm, sl = mod(x)
    jax.block_until_ready(new_x)
    assert new_x.shape == x.shape and new_x.dtype == x.dtype
    x_id, _, _ = mod(x, p=0.0)
    assert x_id is x

    print("KERNEL_OK")
</pallas_src>

<mosaic_0001>
module attributes {stable_mosaic.version = 11 : i64} {
  func.func @_seq_mask_gather_kernel(%arg0: i32, %arg1: i32, %arg2: memref<16xi32, #tpu.memory_space<smem>>, %arg3: memref<2xi32, #tpu.memory_space<smem>>, %arg4: memref<1x8x128xf32, #tpu.memory_space<vmem>>, %arg5: memref<1x8x128xf32, #tpu.memory_space<vmem>>) attributes {dimension_semantics = [#tpu.dimension_semantics<parallel>, #tpu.dimension_semantics<parallel>], iteration_bounds = array<i64: 2, 1>, scalar_prefetch = 2 : i64, scratch_operands = 0 : i64, tpu.core_type = #tpu.core_type<tc>, window_params = [{transform_indices = @transform_0, window_bounds = array<i64: 1, 8, 128>}, {transform_indices = @transform_1, window_bounds = array<i64: 1, 8, 128>}]} {
    %0 = arith.index_cast %arg0 : i32 to index
    %1 = memref.load %arg3[%0] : memref<2xi32, #tpu.memory_space<smem>>
    %c8_i32 = arith.constant 8 : i32
    %2 = arith.muli %arg1, %c8_i32 : i32
    %c0_i32 = arith.constant 0 : i32
    %3 = arith.addi %2, %c0_i32 : i32
    %c8_i32_0 = arith.constant 8 : i32
    %4 = arith.muli %arg0, %c8_i32_0 : i32
    %5 = arith.addi %4, %3 : i32
    %6 = arith.index_cast %5 : i32 to index
    %7 = memref.load %arg2[%6] : memref<16xi32, #tpu.memory_space<smem>>
    %8 = arith.cmpi sge, %3, %1 : i32
    %c0 = arith.constant 0 : index
    %9 = arith.index_cast %7 : i32 to index
    %c0_1 = arith.constant 0 : index
    %10 = vector.load %arg4[%c0, %9, %c0_1] : memref<1x8x128xf32, #tpu.memory_space<vmem>>, vector<1x1x128xf32>
    %cst = arith.constant 0.000000e+00 : f32
    %11 = vector.broadcast %cst : f32 to vector<1x1x128xf32>
    %12 = arith.select %8, %10, %11 : vector<1x1x128xf32>
    %c0_2 = arith.constant 0 : index
    %c0_3 = arith.constant 0 : index
    %c0_4 = arith.constant 0 : index
    %13 = vector.load %arg5[%c0_2, %c0_3, %c0_4] : memref<1x8x128xf32, #tpu.memory_space<vmem>>, vector<1x1x128xf32>
    tpu.vector_store %arg5[%c0_2, %c0_3, %c0_4], %12 {strides = array<i32>} : memref<1x8x128xf32, #tpu.memory_space<vmem>>, vector<1x1x128xf32>,
    %c1_i32 = arith.constant 1 : i32
    %14 = arith.addi %2, %c1_i32 : i32
    %c8_i32_5 = arith.constant 8 : i32
    %15 = arith.muli %arg0, %c8_i32_5 : i32
    %16 = arith.addi %15, %14 : i32
    %17 = arith.index_cast %16 : i32 to index
    %18 = memref.load %arg2[%17] : memref<16xi32, #tpu.memory_space<smem>>
    %19 = arith.cmpi sge, %14, %1 : i32
    %c0_6 = arith.constant 0 : index
    %20 = arith.index_cast %18 : i32 to index
    %c0_7 = arith.constant 0 : index
    %21 = vector.load %arg4[%c0_6, %20, %c0_7] : memref<1x8x128xf32, #tpu.memory_space<vmem>>, vector<1x1x128xf32>
    %cst_8 = arith.constant 0.000000e+00 : f32
    %22 = vector.broadcast %cst_8 : f32 to vector<1x1x128xf32>
    %23 = arith.select %19, %21, %22 : vector<1x1x128xf32>
    %c0_9 = arith.constant 0 : index
    %c1 = arith.constant 1 : index
    %c0_10 = arith.constant 0 : index
    %24 = vector.load %arg5[%c0_9, %c1, %c0_10] : memref<1x8x128xf32, #tpu.memory_space<vmem>>, vector<1x1x128xf32>
    tpu.vector_store %arg5[%c0_9, %c1, %c0_10], %23 {strides = array<i32>} : memref<1x8x128xf32, #tpu.memory_space<vmem>>, vector<1x1x128xf32>,
    %c2_i32 = arith.constant 2 : i32
    %25 = arith.addi %2, %c2_i32 : i32
    %c8_i32_11 = arith.constant 8 : i32
    %26 = arith.muli %arg0, %c8_i32_11 : i32
    %27 = arith.addi %26, %25 : i32
    %28 = arith.index_cast %27 : i32 to index
    %29 = memref.load %arg2[%28] : memref<16xi32, #tpu.memory_space<smem>>
    %30 = arith.cmpi sge, %25, %1 : i32
    %c0_12 = arith.constant 0 : index
    %31 = arith.index_cast %29 : i32 to index
    %c0_13 = arith.constant 0 : index
    %32 = vector.load %arg4[%c0_12, %31, %c0_13] : memref<1x8x128xf32, #tpu.memory_space<vmem>>, vector<1x1x128xf32>
    %cst_14 = arith.constant 0.000000e+00 : f32
    %33 = vector.broadcast %cst_14 : f32 to vector<1x1x128xf32>
    %34 = arith.select %30, %32, %33 : vector<1x1x128xf32>
    %c0_15 = arith.constant 0 : index
    %c2 = arith.constant 2 : index
    %c0_16 = arith.constant 0 : index
    %35 = vector.load %arg5[%c0_15, %c2, %c0_16] : memref<1x8x128xf32, #tpu.memory_space<vmem>>, vector<1x1x128xf32>
    tpu.vector_store %arg5[%c0_15, %c2, %c0_16], %34 {strides = array<i32>} : memref<1x8x128xf32, #tpu.memory_space<vmem>>, vector<1x1x128xf32>,
    %c3_i32 = arith.constant 3 : i32
    %36 = arith.addi %2, %c3_i32 : i32
    %c8_i32_17 = arith.constant 8 : i32
    %37 = arith.muli %arg0, %c8_i32_17 : i32
    %38 = arith.addi %37, %36 : i32
    %39 = arith.index_cast %38 : i32 to index
    %40 = memref.load %arg2[%39] : memref<16xi32, #tpu.memory_space<smem>>
    %41 = arith.cmpi sge, %36, %1 : i32
    %c0_18 = arith.constant 0 : index
    %42 = arith.index_cast %40 : i32 to index
    %c0_19 = arith.constant 0 : index
    %43 = vector.load %arg4[%c0_18, %42, %c0_19] : memref<1x8x128xf32, #tpu.memory_space<vmem>>, vector<1x1x128xf32>
    %cst_20 = arith.constant 0.000000e+00 : f32
    %44 = vector.broadcast %cst_20 : f32 to vector<1x1x128xf32>
    %45 = arith.select %41, %43, %44 : vector<1x1x128xf32>
    %c0_21 = arith.constant 0 : index
    %c3 = arith.constant 3 : index
    %c0_22 = arith.constant 0 : index
    %46 = vector.load %arg5[%c0_21, %c3, %c0_22] : memref<1x8x128xf32, #tpu.memory_space<vmem>>, vector<1x1x128xf32>
    tpu.vector_store %arg5[%c0_21, %c3, %c0_22], %45 {strides = array<i32>} : memref<1x8x128xf32, #tpu.memory_space<vmem>>, vector<1x1x128xf32>,
    %c4_i32 = arith.constant 4 : i32
    %47 = arith.addi %2, %c4_i32 : i32
    %c8_i32_23 = arith.constant 8 : i32
    %48 = arith.muli %arg0, %c8_i32_23 : i32
    %49 = arith.addi %48, %47 : i32
    %50 = arith.index_cast %49 : i32 to index
    %51 = memref.load %arg2[%50] : memref<16xi32, #tpu.memory_space<smem>>
    %52 = arith.cmpi sge, %47, %1 : i32
    %c0_24 = arith.constant 0 : index
    %53 = arith.index_cast %51 : i32 to index
    %c0_25 = arith.constant 0 : index
    %54 = vector.load %arg4[%c0_24, %53, %c0_25] : memref<1x8x128xf32, #tpu.memory_space<vmem>>, vector<1x1x128xf32>
    %cst_26 = arith.constant 0.000000e+00 : f32
    %55 = vector.broadcast %cst_26 : f32 to vector<1x1x128xf32>
    %56 = arith.select %52, %54, %55 : vector<1x1x128xf32>
    %c0_27 = arith.constant 0 : index
    %c4 = arith.constant 4 : index
    %c0_28 = arith.constant 0 : index
    %57 = vector.load %arg5[%c0_27, %c4, %c0_28] : memref<1x8x128xf32, #tpu.memory_space<vmem>>, vector<1x1x128xf32>
    tpu.vector_store %arg5[%c0_27, %c4, %c0_28], %56 {strides = array<i32>} : memref<1x8x128xf32, #tpu.memory_space<vmem>>, vector<1x1x128xf32>,
    %c5_i32 = arith.constant 5 : i32
    %58 = arith.addi %2, %c5_i32 : i32
    %c8_i32_29 = arith.constant 8 : i32
    %59 = arith.muli %arg0, %c8_i32_29 : i32
    %60 = arith.addi %59, %58 : i32
    %61 = arith.index_cast %60 : i32 to index
    %62 = memref.load %arg2[%61] : memref<16xi32, #tpu.memory_space<smem>>
    %63 = arith.cmpi sge, %58, %1 : i32
    %c0_30 = arith.constant 0 : index
    %64 = arith.index_cast %62 : i32 to index
    %c0_31 = arith.constant 0 : index
    %65 = vector.load %arg4[%c0_30, %64, %c0_31] : memref<1x8x128xf32, #tpu.memory_space<vmem>>, vector<1x1x128xf32>
    %cst_32 = arith.constant 0.000000e+00 : f32
    %66 = vector.broadcast %cst_32 : f32 to vector<1x1x128xf32>
    %67 = arith.select %63, %65, %66 : vector<1x1x128xf32>
    %c0_33 = arith.constant 0 : index
    %c5 = arith.constant 5 : index
    %c0_34 = arith.constant 0 : index
    %68 = vector.load %arg5[%c0_33, %c5, %c0_34] : memref<1x8x128xf32, #tpu.memory_space<vmem>>, vector<1x1x128xf32>
    tpu.vector_store %arg5[%c0_33, %c5, %c0_34], %67 {strides = array<i32>} : memref<1x8x128xf32, #tpu.memory_space<vmem>>, vector<1x1x128xf32>,
    %c6_i32 = arith.constant 6 : i32
    %69 = arith.addi %2, %c6_i32 : i32
    %c8_i32_35 = arith.constant 8 : i32
    %70 = arith.muli %arg0, %c8_i32_35 : i32
    %71 = arith.addi %70, %69 : i32
    %72 = arith.index_cast %71 : i32 to index
    %73 = memref.load %arg2[%72] : memref<16xi32, #tpu.memory_space<smem>>
    %74 = arith.cmpi sge, %69, %1 : i32
    %c0_36 = arith.constant 0 : index
    %75 = arith.index_cast %73 : i32 to index
    %c0_37 = arith.constant 0 : index
    %76 = vector.load %arg4[%c0_36, %75, %c0_37] : memref<1x8x128xf32, #tpu.memory_space<vmem>>, vector<1x1x128xf32>
    %cst_38 = arith.constant 0.000000e+00 : f32
    %77 = vector.broadcast %cst_38 : f32 to vector<1x1x128xf32>
    %78 = arith.select %74, %76, %77 : vector<1x1x128xf32>
    %c0_39 = arith.constant 0 : index
    %c6 = arith.constant 6 : index
    %c0_40 = arith.constant 0 : index
    %79 = vector.load %arg5[%c0_39, %c6, %c0_40] : memref<1x8x128xf32, #tpu.memory_space<vmem>>, vector<1x1x128xf32>
    tpu.vector_store %arg5[%c0_39, %c6, %c0_40], %78 {strides = array<i32>} : memref<1x8x128xf32, #tpu.memory_space<vmem>>, vector<1x1x128xf32>,
    %c7_i32 = arith.constant 7 : i32
    %80 = arith.addi %2, %c7_i32 : i32
    %c8_i32_41 = arith.constant 8 : i32
    %81 = arith.muli %arg0, %c8_i32_41 : i32
    %82 = arith.addi %81, %80 : i32
    %83 = arith.index_cast %82 : i32 to index
    %84 = memref.load %arg2[%83] : memref<16xi32, #tpu.memory_space<smem>>
    %85 = arith.cmpi sge, %80, %1 : i32
    %c0_42 = arith.constant 0 : index
    %86 = arith.index_cast %84 : i32 to index
    %c0_43 = arith.constant 0 : index
    %87 = vector.load %arg4[%c0_42, %86, %c0_43] : memref<1x8x128xf32, #tpu.memory_space<vmem>>, vector<1x1x128xf32>
    %cst_44 = arith.constant 0.000000e+00 : f32
    %88 = vector.broadcast %cst_44 : f32 to vector<1x1x128xf32>
    %89 = arith.select %85, %87, %88 : vector<1x1x128xf32>
    %c0_45 = arith.constant 0 : index
    %c7 = arith.constant 7 : index
    %c0_46 = arith.constant 0 : index
    %90 = vector.load %arg5[%c0_45, %c7, %c0_46] : memref<1x8x128xf32, #tpu.memory_space<vmem>>, vector<1x1x128xf32>
    tpu.vector_store %arg5[%c0_45, %c7, %c0_46], %89 {strides = array<i32>} : memref<1x8x128xf32, #tpu.memory_space<vmem>>, vector<1x1x128xf32>,
    return
  }
  func.func @transform_0(%arg0: i32, %arg1: i32, %arg2: memref<16xi32, #tpu.memory_space<smem>>, %arg3: memref<2xi32, #tpu.memory_space<smem>>) -> (i32, i32, i32) {
    %c0_i32 = arith.constant 0 : i32
    %c0_i32_0 = arith.constant 0 : i32
    %c0_i32_1 = arith.constant 0 : i32
    return %arg0, %c0_i32, %c0_i32_0 : i32, i32, i32
  }
  func.func @transform_1(%arg0: i32, %arg1: i32, %arg2: memref<16xi32, #tpu.memory_space<smem>>, %arg3: memref<2xi32, #tpu.memory_space<smem>>) -> (i32, i32, i32) {
    %c0_i32 = arith.constant 0 : i32
    %c0_i32_0 = arith.constant 0 : i32
    return %arg0, %arg1, %c0_i32 : i32, i32, i32
  }
}

</mosaic_0001>

<bundles_post_ra>
// kernel: tpu_custom_call.1
= control target key start
LH: loop header
LB: loop body
LE: loop exit
PB: predicated region body
PF: predicated region fallthrough
CT: control target
= control target key end

     0   :  { %s840_s0 = inlined_call_operand.hbm [shape: s32[16], index: 0, kind: input, shape index: {}]   ;;  %s841_s2 = inlined_call_operand.hbm [shape: f32[2,8,128], index: 2, kind: input, shape index: {}]   ;;  %s842_s3 = inlined_call_operand.hbm [shape: f32[2,8,128], index: 3, kind: output, shape index: {}]   ;;  %s843_s1 = inlined_call_operand.vmem [shape: s32[2], index: 1, kind: input, shape index: {}]  }
   0x1   :  { %s434_s14 = scalar_lea.hbm %s840_s0, 16 }
   0x2   :  { %p435_p0 = scmp.ne.s32.totalorder %s840_s0, %s434_s14  ;;  %p438_p1 = scmp.lt.u32.totalorder %s434_s14, %s840_s0 }
   0x4   :  { %p440_p2 = pnand %p438_p1, %p435_p0 }
   0x6   :  { %443 = shalt.err (!%p440_p2)  }
   0x7   :  { %s572_s19 = smov [#allocation3]   ;;  %s10_s24 = sshll.u32 %s843_s1, 4  ;;  %s11_s24 = int_to_ptr.vmem [resolvable:$true] %s10_s24 }
   0x8   :  { %9 = dma.hbm_to_smem %s840_s0, 16, %s572_s19, [#allocation2] }
   0x9   :  { %s444_s25 = scalar_lea.vmem %s11_s24, 16  ;;  %p449_p4 = scmp.lt.s32.totalorder %s11_s24, %s11_s24 }
   0xa   :  { %p445_p3 = scmp.ne.s32.totalorder %s11_s24, %s444_s25  ;;  %p450_p5 = scmp.lt.s32.totalorder %s444_s25, %s444_s25 }
   0xc   :  { %p451_p6 = por %p450_p5, %p449_p4 }
   0xe   :  { %p452_p7 = pnand %p451_p6, %p445_p3 }
  0x10   :  { %455 = shalt.err (!%p452_p7)  }
  0x11   :  { %s573_s26 = smov [#allocation4]  }
  0x12   :  { %13 = dma.vmem_to_smem %s11_s24, 16, %s573_s26, [#allocation2] }
  0x13   :  { %538 = dma.done.wait [#allocation2], 32 }
  0x14   :  { %539 = vsyncadd [#allocation2], 4294967264 }
  0x15   :  { %15 = sfence }
  0x16   :  { %16 = vsyncpa [#allocation6], 0 }
  0x17   :  { %18 = vsyncpa [#allocation6 + $0x1], 0 }
  0x18   :  { %19 = vsyncpa [#allocation7], 0 }
  0x19   :  { %21 = vsyncpa [#allocation7 + $0x1], 0  ;;  %s611_s0 = smov 0   ;;  %s613_s1 = smov 0  }
  0x1a   :  { %s615_s27 = smov 0   ;;  %s617_s28 = smov 0  }
  0x1b   :  { %s619_s29 = smov 0   ;;  %s621_s30 = smov 0  }
  0x1c LB: > { %s348_s4 = sadd.s32 4294967295, %s570_s30   ;;  %s349_s5 = sadd.s32 4294967294, %s570_s30   ;;  %s570_s30 = sphi %s621_s30, %s27_s30   ;;  %s566_s29 = sphi %s619_s29, %s859_s29   ;;  %s562_s28 = sphi %s617_s28, %s858_s28   ;;  %s558_s27 = sphi %s615_s27, %s857_s27   ;;  %s554_s1 = sphi %s613_s1, %s856_s1   ;;  %s550_s0 = sphi %s611_s0, %s855_s0  }
  0x1d   : > { %s39_s6 = sadd.s32 1, %s566_s29  ;;  %s46_s7 = sadd.s32 1, %s558_s27 }
  0x1e   : > { %p41_p8 = scmp.ge.s32.totalorder %s39_s6, 2  ;;  %p53_p9 = scmp.ne.s32.totalorder %s558_s27, %s554_s1 }
  0x1f   : > { %p54_p10 = scmp.eq.s32.totalorder %s570_s30, 0  ;;  %p59_p11 = scmp.ne.s32.totalorder %s554_s1, %s550_s0 }
  0x20   : > { %s861_s6 = smov (%p41_p8, %s39_s6), 0  ;;  %p60_p13 = scmp.eq.s32.totalorder %s348_s4, 0 }
  0x21   : > { %p652_p12 = por %p54_p10, %p53_p9  ;;  %s43_s9 = ssub.s32 %s566_s29, %s861_s6 }
  0x22   : > { %p85_p0 = scmp.eq.s32.totalorder %s348_s4, 1  ;;  %p44_p1 = scmp.eq.s32.totalorder %s43_s9, 0 }
  0x23   : > { %p658_p2 = por %p60_p13, %p59_p11  ;;  %p91_p4 = scmp.eq.s32.totalorder %s349_s5, 1 }
  0x24   : > { %p662_p3 = por %p85_p0, %p53_p9  ;;  %p382_p7 = scmp.lt.s32.totalorder %s570_s30, 2 }
  0x25   : > { %s667_s12 = scalar_select %p44_p1, %s558_s27, %s46_s7  }
  0x26   : > { %s847_s11 = scalar_select %p662_p3, 1, 0 }
  0x27   : > { %p669_p5 = por %p91_p4, %p59_p11  ;;  %s111_s14 = sand.u32 1, %s558_s27  }
  0x28   : > { %s352_s15 = sshll.u32 %s111_s14, 3  ;;  %s353_s16 = sshll.u32 %s566_s29, 7 }
  0x29   : > { %s848_s13 = scalar_select %p669_p5, 1, 0 }
  0x2a   : > { %s680_s19 = scalar_lea.hbm %s841_s2, %s353_s16  ;;  %s115_s20 = scalar_lea.vmem [#allocation5], %s352_s15 }
  0x2b   : > { %s122_s21 = sshll.u32 %s115_s20, 4  ;;  %p686_p8 = pnand %p382_p7, %p652_p12  ;;  %s682_s21 = int_to_ptr.vmem [resolvable:$true] %s122_s21 }
  0x2c   : > { %s112_s23 = scalar_lea.sflag [#allocation6], %s111_s14  ;;  %s456_s24 = scalar_lea.hbm %s680_s19, 128 }
  0x2d   : > { %p457_p11 = scmp.ne.s32.totalorder %s680_s19, %s456_s24  ;;  %p458_p13 = pneg %p686_p8 }
  0x2e   : > { %s461_s4 = scalar_lea.hbm %s841_s2, 256  ;;  %p462_p12 = scmp.lt.u32.totalorder %s680_s19, %s841_s2 }
  0x2f   : > { %p459_p0 = pnand %p458_p13, %p457_p11  ;;  %p463_p4 = scmp.lt.u32.totalorder %s461_s4, %s456_s24 }
  0x30   : > { %p465_p6 = scmp.lt.u32.totalorder %s456_s24, %s680_s19 }
  0x31   : > { %p460_p1 = pneg %p459_p0  ;;  %p464_p7 = por %p463_p4, %p462_p12 }
  0x33   : > { %p466_p9 = por %p465_p6, %p464_p7 }
  0x35   : > { %p467_p10 = pnand %p466_p9, %p460_p1 }
  0x37   : > { %470 = shalt.err (!%p467_p10)
}
  0x38   : > { %s471_s8 = scalar_lea.vmem %s682_s21, 128  ;;  %s574_s9 = smov [#allocation5]  }
  0x39   : > { %p472_p11 = scmp.ne.s32.totalorder %s682_s21, %s471_s8  ;;  %s476_s14 = sshll.u32 %s574_s9, 4  ;;  %s477_s14 = int_to_ptr.vmem [resolvable:$false] %s476_s14 }
  0x3a   : > { %s478_s15 = scalar_lea.vmem %s477_s14, 256  ;;  %p479_p3 = scmp.lt.s32.totalorder %s682_s21, %s477_s14 }
  0x3b   : > { %p474_p0 = pnand %p472_p11, %p458_p13  ;;  %p480_p12 = scmp.lt.s32.totalorder %s478_s15, %s471_s8 }
  0x3d   : > { %p475_p5 = pneg %p474_p0  ;;  %p481_p4 = por %p480_p12, %p479_p3 }
  0x3f   : > { %p482_p6 = pnand %p481_p4, %p475_p5 }
  0x41   : > { %485 = shalt.err (!%p482_p6)
}
  0x42   : > { %377 = dma.hbm_to_vmem [thread:$0]  (!%p686_p8), %s680_s19, 128, %s682_s21, %s112_s23  }
  0x43   : > { %p850_p9 = scmp.lt.s32.totalorder %s570_s30, 3  ;;  %p851_p10 = scmp.ge.s32.totalorder %s570_s30, 1 }
  0x45   : > { %p128_p13 = pnand %p851_p10, %p850_p9 }
  0x46   : > { %s722_s16 = sand.u32 (!%p128_p13), 1, %s554_s1  }
  0x47   : > { %131 = sbr.rel (%p128_p13) target bundleno = 129 (0x81), region = 24  ;;  %s355_s17 = sshll.u32 (!%p128_p13), %s722_s16, 3 }
  0x48   : > { %s134_s18 = scalar_lea.sflag (!%p128_p13), [#allocation6], %s722_s16  ;;  %s728_s20 = scalar_lea.vmem (!%p128_p13), [#allocation5], %s355_s17 }
  0x4e   : > { %541 = dma.done.wait (%p658_p2), %s134_s18, 128  }
  0x4f   : > { %543 = vsyncadd (%p658_p2), %s134_s18, 4294967168  ;;  %s735_s19 = sshll.u32 %s562_s28, 3  ;;  %s738_s21 = sld [smem:[#allocation4 + %s562_s28]] }
  0x50   : > { %s160_s22 = sld [smem:[#allocation3 + %s735_s19]]  ;;  %s170_s10 = sadd.s32 1, %s735_s19 }
  0x51   : > { %s181_s23 = sadd.s32 2, %s735_s19  ;;  %s171_s24 = sld [smem:[#allocation3 + %s170_s10]] }
  0x52   : > { %s182_s25 = sld [smem:[#allocation3 + %s181_s23]]  ;;  %s192_s26 = sadd.s32 3, %s735_s19 }
  0x53   : > { %s203_s4 = sadd.s32 4, %s735_s19  ;;  %s745_s5 = sld [smem:[#allocation3 + %s192_s26]] }
  0x54   : > { %s747_s7 = sld [smem:[#allocation3 + %s203_s4]]  ;;  %s214_s8 = sadd.s32 5, %s735_s19 }
  0x55   : > { %s225_s9 = sadd.s32 6, %s735_s19  ;;  %p358_p2 = scmp.le.s32.totalorder %s738_s21, 0 }
  0x56   : > { %s162_s14 = scalar_lea.vmem %s728_s20, %s160_s22 [#allocation5]  ;;  %p359_p3 = scmp.le.s32.totalorder %s738_s21, 1 }
  0x57   : > { %p360_p5 = scmp.le.s32.totalorder %s738_s21, 2  ;;  %v163_v0 = vld [vmem:[%s162_s14] sm:$0x1]  ;;  %s173_s18 = scalar_lea.vmem %s728_s20, %s171_s24 [#allocation5] }
  0x58   : > { %s164_s15 = scalar_select %p358_p2, 1, 0  ;;  %v174_v2 = vld [vmem:[%s173_s18] sm:$0x1] }
  0x59   : > { %s184_s10 = scalar_lea.vmem %s728_s20, %s182_s25 [#allocation5]  ;;  %p361_p8 = scmp.le.s32.totalorder %s738_s21, 3 }
  0x5a   : > { %v165_v1 = vstv %s164_s15  ;;  %s175_s23 = scalar_select %p359_p3, 1, 0  ;;  %v185_v5 = vld [vmem:[%s184_s10] sm:$0x1] }
  0x5b   : > { %vm166_vm0 = vcmp.eq.s32.totalorder %v165_v1, 1  ;;  %s186_s26 = scalar_select %p360_p5, 1, 0 }
  0x5c   : > { %v167_v3 = vsel %vm166_vm0, %v163_v0, 0.0  ;;  %v176_v4 = vstv %s175_s23  ;;  %s195_s22 = scalar_lea.vmem %s728_s20, %s745_s5 [#allocation5]  ;;  %s762_s4 = scalar_lea.vmem [#allocation8], %s355_s17 }
  0x5d   : > { %168 = vst [vmem:[%s762_s4] sm:$0x1] %v167_v3  ;;  %vm177_vm1 = vcmp.eq.s32.totalorder %v176_v4, 1  ;;  %v187_v6 = vstv %s186_s26  ;;  %p362_p1 = scmp.le.s32.totalorder %s738_s21, 4  ;;  %s206_s24 = scalar_lea.vmem %s728_s20, %s747_s7 [#allocation5]  ;;  %v196_v9 = vld [vmem:[%s195_s22] sm:$0x1] }
  0x5e   : > { %v178_v7 = vsel %vm177_vm1, %v174_v2, 0.0  ;;  %vm188_vm2 = vcmp.eq.s32.totalorder %v187_v6, 1  ;;  %s197_s25 = scalar_select %p361_p8, 1, 0  ;;  %v207_v11 = vld [vmem:[%s206_s24] sm:$0x1] }
  0x5f   : > { %179 = vst [vmem:[%s762_s4 + $0x1] sm:$0x1] %v178_v7  ;;  %v189_v8 = vsel %vm188_vm2, %v185_v5, 0.0  ;;  %s208_s17 = scalar_select %p362_p1, 1, 0 }
  0x60   : > { %190 = vst [vmem:[%s762_s4 + $0x2] sm:$0x1] %v189_v8  ;;  %v198_v10 = vstv %s197_s25  ;;  %s215_s5 = sld [smem:[#allocation3 + %s214_s8]]  ;;  %p363_p7 = scmp.le.s32.totalorder %s738_s21, 5 }
  0x61   : > { %vm199_vm3 = vcmp.eq.s32.totalorder %v198_v10, 1  ;;  %v209_v12 = vstv %s208_s17  ;;  %s226_s7 = sld [smem:[#allocation3 + %s225_s9]]  ;;  %p364_p11 = scmp.le.s32.totalorder %s738_s21, 6 }
  0x62   : > { %v200_v13 = vsel %vm199_vm3, %v196_v9, 0.0  ;;  %vm210_vm4 = vcmp.eq.s32.totalorder %v209_v12, 1  ;;  %s219_s14 = scalar_select %p363_p7, 1, 0 }
  0x63   : > { %201 = vst [vmem:[%s762_s4 + $0x3] sm:$0x1] %v200_v13  ;;  %v211_v14 = vsel %vm210_vm4, %v207_v11, 0.0  ;;  %s230_s15 = scalar_select %p364_p11, 1, 0 }
  0x64   : > { %212 = vst [vmem:[%s762_s4 + $0x4] sm:$0x1] %v211_v14  ;;  %v220_v15 = vstv %s219_s14  ;;  %s236_s8 = sadd.s32 7, %s735_s19  ;;  %p365_p0 = scmp.le.s32.totalorder %s738_s21, 7 }
  0x65   : > { %vm221_vm5 = vcmp.eq.s32.totalorder %v220_v15, 1  ;;  %v231_v16 = vstv %s230_s15  ;;  %s237_s9 = sld [smem:[#allocation3 + %s236_s8]]  ;;  %s367_s26 = sshll.u32 %s562_s28, 7 }
  0x66   : > { %s217_s18 = scalar_lea.vmem %s728_s20, %s215_s5 [#allocation5]  ;;  %vm232_vm6 = vcmp.eq.s32.totalorder %v231_v16, 1  ;;  %s261_s19 = sshll.u32 %s762_s4, 4  ;;  %s792_s19 = int_to_ptr.vmem [resolvable:$true] %s261_s19 }
  0x67   : > { %v218_v17 = vld [vmem:[%s217_s18] sm:$0x1]  ;;  %s228_s10 = scalar_lea.vmem %s728_s20, %s226_s7 [#allocation5]  ;;  %s790_s25 = scalar_lea.hbm %s842_s3, %s367_s26 }
  0x68   : > { %v222_v18 = vsel %vm221_vm5, %v218_v17, 0.0  ;;  %v229_v19 = vld [vmem:[%s228_s10] sm:$0x1]  ;;  %s241_s23 = scalar_select %p365_p0, 1, 0 }
  0x69   : > { %223 = vst [vmem:[%s762_s4 + $0x5] sm:$0x1] %v222_v18  ;;  %v233_v20 = vsel %vm232_vm6, %v229_v19, 0.0  ;;  %s247_s17 = scalar_lea.sflag [#allocation7], %s722_s16  ;;  %s486_s28 = scalar_lea.vmem %s792_s19, 128 }
  0x6a   : > { %234 = vst [vmem:[%s762_s4 + $0x6] sm:$0x1] %v233_v20  ;;  %v242_v21 = vstv %s241_s23  ;;  %p487_p12 = scmp.ne.s32.totalorder %s792_s19, %s486_s28  ;;  %p852_p4 = scmp.ne.s32.totalorder %s847_s11, 0 }
  0x6b   : > { %s239_s21 = scalar_lea.vmem %s728_s20, %s237_s9 [#allocation5]  ;;  %vm243_vm7 = vcmp.eq.s32.totalorder %v242_v21, 1  ;;  %s575_s20 = smov [#allocation8]  }
  0x6c   : > { %v240_v22 = vld [vmem:[%s239_s21] sm:$0x1]  ;;  %p488_p6 = pnand %p487_p12, %p852_p4  ;;  %s490_s5 = sshll.u32 %s575_s20, 4  ;;  %s491_s5 = int_to_ptr.vmem [resolvable:$false] %s490_s5 }
  0x6d   : > { %v244_v23 = vsel %vm243_vm7, %v240_v22, 0.0  ;;  %s492_s7 = scalar_lea.vmem %s491_s5, 256  ;;  %p493_p10 = scmp.lt.s32.totalorder %s792_s19, %s491_s5 }
  0x6e   : > { %245 = vst [vmem:[%s762_s4 + $0x7] sm:$0x1] %v244_v23  ;;  %p489_p9 = pneg %p488_p6  ;;  %p494_p13 = scmp.lt.s32.totalorder %s492_s7, %s486_s28 }
  0x70   : > { %p495_p2 = por %p494_p13, %p493_p10 }
  0x72   : > { %p496_p3 = pnand %p495_p2, %p489_p9 }
  0x74   : > { %499 = shalt.err (!%p496_p3)
}
  0x75   : > { %s500_s16 = scalar_lea.hbm %s790_s25, 128  ;;  %s504_s15 = scalar_lea.hbm %s842_s3, 256 }
  0x76   : > { %p501_p5 = scmp.ne.s32.totalorder %s790_s25, %s500_s16  ;;  %p505_p7 = scmp.lt.u32.totalorder %s790_s25, %s842_s3 }
  0x77   : > { %p506_p11 = scmp.lt.u32.totalorder %s504_s15, %s500_s16  ;;  %p508_p12 = scmp.lt.u32.totalorder %s500_s16, %s790_s25 }
  0x78   : > { %p502_p8 = pnand %p501_p5, %p852_p4 }
  0x79   : > { %p507_p0 = por %p506_p11, %p505_p7 }
  0x7a   : > { %p503_p1 = pneg %p502_p8 }
  0x7b   : > { %p509_p6 = por %p508_p12, %p507_p0 }
  0x7d   : > { %p510_p9 = pnand %p509_p6, %p503_p1 }
  0x7f   : > { %513 = shalt.err (!%p510_p9)
}
  0x80   : > { %372 = dma.vmem_to_hbm [thread:$0]  (%p852_p4), %s792_s19, 128, %s790_s25, %s247_s17  }
  0x81 PF: > { %s273_s18 = sand.u32 1, %s550_s0   ;;  %p853_p10 = scmp.ne.s32.totalorder %s848_s13, 0 }
  0x82   : > { %p854_p13 = scmp.ge.s32.totalorder %s570_s30, 2  ;;  %s274_s10 = scalar_lea.sflag [#allocation7], %s273_s18 }
  0x84   : > { %p379_p2 = pnand %p854_p13, %p853_p10 }
  0x86   : > { %545 = dma.done.wait (!%p379_p2), %s274_s10, 128  }
  0x87   : > { %547 = vsyncadd (!%p379_p2), %s274_s10, 4294967168  ;;  %s27_s30 = sadd.s32 1, %s570_s30   ;;  %s855_s0 = smov %s554_s1 }
  0x88   : > { %p24_p3 = scmp.ge.s32.totalorder %s27_s30, 4   ;;  %s856_s1 = smov %s558_s27 }
  0x89   : > { %s857_s27 = smov %s667_s12  ;;  %s858_s28 = smov %s566_s29 }
  0x8a   : > { %s859_s29 = smov %s861_s6  ;;  %26 = sbr.rel (!%p24_p3) target bundleno = 28 (0x1c), region = 77 }
  0x91   :  { %279 = vsyncpa [#allocation6], 1 }
  0x92   :  { %281 = vsyncpa [#allocation6 + $0x1], 1 }
  0x93   :  { %282 = vsyncpa [#allocation7], 1 }
  0x94   :  { %284 = vsyncpa [#allocation7 + $0x1], 1 }

</bundles_post_ra>
